<compile_context>
chip_gen: v7x
topology: tpu7x:2x2x1
jax: 0.10.0
libtpu: 0.0.40
codegen_flags: <defaults>
</compile_context>

<pallas_src>
import functools

import jax
import jax.numpy as jnp
from jax.experimental import pallas as pl
from jax.experimental.pallas import tpu as pltpu


def _round_up(n: int, m: int) -> int:
    return pl.cdiv(n, m) * m


def _ad_mlp_kernel(x_ref, w1_ref, b1_ref, w2_ref, b2_ref, w3_ref, b3_ref, o_ref):
    # Layer 1: Linear(in_pad, 512) + ReLU   (f32 accumulation on the MXU)
    h = jnp.dot(x_ref[...], w1_ref[...], preferred_element_type=jnp.float32)
    h = jnp.maximum(h + b1_ref[...].astype(jnp.float32), 0.0)
    # Layer 2: Linear(512, 512) + ReLU
    h = jnp.dot(h.astype(w2_ref.dtype), w2_ref[...],
                preferred_element_type=jnp.float32)
    h = jnp.maximum(h + b2_ref[...].astype(jnp.float32), 0.0)
    # Layer 3: Linear(512, out_pad)
    out = jnp.dot(h.astype(w3_ref.dtype), w3_ref[...],
                  preferred_element_type=jnp.float32)
    out = out + b3_ref[...].astype(jnp.float32)
    o_ref[...] = out.astype(o_ref.dtype)


@functools.partial(jax.jit, static_argnames=("block_b", "compute_dtype"))
def ad_mlp_forward(x, w1, b1, w2, b2, w3, b3, *, block_b=512,
                   compute_dtype=jnp.float32):
    """x: [B, in_dim] float32; weights stored as [fan_in, fan_out].

    Returns [B, out_dim] float32 (same math as PyTorch x @ W.T + b).
    compute_dtype=jnp.bfloat16 enables bf16 MXU operands with f32 accumulation.
    """
    B, in_dim = x.shape
    hidden = w1.shape[1]
    out_dim = w3.shape[1]

    # --- lane/sublane padding (zero-pad; zeros contribute nothing) ----------
    in_pad = _round_up(in_dim, 128)
    out_pad = _round_up(out_dim, 128)

    # Batch tile: multiple of 8, no larger than the padded batch.
    block_b = max(8, min(block_b, _round_up(B, 8)))
    B_pad = _round_up(B, block_b)

    if B_pad != B or in_pad != in_dim:
        x = jnp.pad(x, ((0, B_pad - B), (0, in_pad - in_dim)))
    if in_pad != in_dim:
        w1 = jnp.pad(w1, ((0, in_pad - in_dim), (0, 0)))
    if out_pad != out_dim:
        w3 = jnp.pad(w3, ((0, 0), (0, out_pad - out_dim)))
        b3 = jnp.pad(b3, ((0, 0), (0, out_pad - out_dim)))

    # Optional bf16 operands (accumulation stays f32 inside the kernel).
    x, w1, b1, w2, b2, w3, b3 = (a.astype(compute_dtype)
                                 for a in (x, w1, b1, w2, b2, w3, b3))

    grid = (B_pad // block_b,)

    itemsize = jnp.dtype(compute_dtype).itemsize
    cost = pl.CostEstimate(
        flops=2 * B_pad * (in_pad * hidden + hidden * hidden + hidden * out_pad),
        transcendentals=0,
        bytes_accessed=(B_pad * in_pad * itemsize
                        + (in_pad * hidden + hidden * hidden + hidden * out_pad
                           + 2 * hidden + out_pad) * itemsize
                        + B_pad * out_pad * 4),
    )

    out = pl.pallas_call(
        _ad_mlp_kernel,
        out_shape=jax.ShapeDtypeStruct((B_pad, out_pad), jnp.float32),
        grid_spec=pltpu.PrefetchScalarGridSpec(
            num_scalar_prefetch=0,
            grid=grid,
            in_specs=[
                pl.BlockSpec((block_b, in_pad), lambda i: (i, 0)),   # x tile
                pl.BlockSpec((in_pad, hidden), lambda i: (0, 0)),    # w1
                pl.BlockSpec((1, hidden), lambda i: (0, 0)),         # b1
                pl.BlockSpec((hidden, hidden), lambda i: (0, 0)),    # w2
                pl.BlockSpec((1, hidden), lambda i: (0, 0)),         # b2
                pl.BlockSpec((hidden, out_pad), lambda i: (0, 0)),   # w3
                pl.BlockSpec((1, out_pad), lambda i: (0, 0)),        # b3
            ],
            out_specs=pl.BlockSpec((block_b, out_pad), lambda i: (i, 0)),
        ),
        compiler_params=pltpu.CompilerParams(
            dimension_semantics=("parallel",),
        ),
        cost_estimate=cost,
    )(x, w1, b1, w2, b2, w3, b3)

    return out[:B, :out_dim]


def init_params(key, in_dim, out_dim=6, hidden=512):
    """Deterministic synthetic init (PyTorch-style uniform). W is [fan_in, fan_out]."""
    k1, k2, k3, k4, k5, k6 = jax.random.split(key, 6)

    def linear(kw, kb, fan_in, fan_out):
        bound = 1.0 / jnp.sqrt(fan_in)
        w = jax.random.uniform(kw, (fan_in, fan_out), jnp.float32, -bound, bound)
        b = jax.random.uniform(kb, (1, fan_out), jnp.float32, -bound, bound)
        return w, b

    w1, b1 = linear(k1, k2, in_dim, hidden)
    w2, b2 = linear(k3, k4, hidden, hidden)
    w3, b3 = linear(k5, k6, hidden, out_dim)
    return w1, b1, w2, b2, w3, b3


def ad_mlp_reference(x, w1, b1, w2, b2, w3, b3):
    h = jnp.maximum(x @ w1 + b1, 0.0)
    h = jnp.maximum(h @ w2 + b2, 0.0)
    return h @ w3 + b3


if __name__ == "__main__":
    key = jax.random.PRNGKey(0)
    kx, kp = jax.random.split(key)

    # in_dim = 9 + 3*future_steps; with future_steps=3 -> in_dim=18, out_dim=6.
    batch, in_dim, out_dim = 2, 18, 6
    x = jax.random.normal(kx, (batch, in_dim), dtype=jnp.float32)
    params = init_params(kp, in_dim, out_dim)

    y_ref = ad_mlp_reference(x, *params)

    # f32 operand path (default): tight tolerance vs reference.
    y = ad_mlp_forward(x, *params)
    y = jax.block_until_ready(y)
    assert y.shape == (batch, out_dim)
    assert jnp.allclose(y, y_ref, atol=1e-4, rtol=1e-4), "f32 mismatch vs reference"

    # bf16 operand / f32 accumulation path (v6e/v7x MXU rate): looser tolerance.
    y_bf16 = ad_mlp_forward(x, *params, compute_dtype=jnp.bfloat16)
    y_bf16 = jax.block_until_ready(y_bf16)
    assert y_bf16.shape == (batch, out_dim)
    assert jnp.allclose(y_bf16, y_ref, atol=5e-2, rtol=5e-2), "bf16 mismatch vs reference"

    print("KERNEL_OK")
</pallas_src>

<mosaic_0001>
module attributes {stable_mosaic.version = 11 : i64} {
  func.func @_ad_mlp_kernel(%arg0: i32, %arg1: memref<8x128xf32, #tpu.memory_space<vmem>>, %arg2: memref<128x512xf32, #tpu.memory_space<vmem>>, %arg3: memref<1x512xf32, #tpu.memory_space<vmem>>, %arg4: memref<512x512xf32, #tpu.memory_space<vmem>>, %arg5: memref<1x512xf32, #tpu.memory_space<vmem>>, %arg6: memref<512x128xf32, #tpu.memory_space<vmem>>, %arg7: memref<1x128xf32, #tpu.memory_space<vmem>>, %arg8: memref<8x128xf32, #tpu.memory_space<vmem>>) attributes {dimension_semantics = [#tpu.dimension_semantics<parallel>], iteration_bounds = array<i64: 1>, scalar_prefetch = 0 : i64, scratch_operands = 0 : i64, tpu.core_type = #tpu.core_type<tc>, window_params = [{transform_indices = @transform_0, window_bounds = array<i64: 8, 128>}, {pipeline_mode = #tpu.pipeline_mode<synchronous>, transform_indices = @transform_1, window_bounds = array<i64: 128, 512>}, {pipeline_mode = #tpu.pipeline_mode<synchronous>, transform_indices = @transform_2, window_bounds = array<i64: 1, 512>}, {pipeline_mode = #tpu.pipeline_mode<synchronous>, transform_indices = @transform_3, window_bounds = array<i64: 512, 512>}, {pipeline_mode = #tpu.pipeline_mode<synchronous>, transform_indices = @transform_4, window_bounds = array<i64: 1, 512>}, {pipeline_mode = #tpu.pipeline_mode<synchronous>, transform_indices = @transform_5, window_bounds = array<i64: 512, 128>}, {pipeline_mode = #tpu.pipeline_mode<synchronous>, transform_indices = @transform_6, window_bounds = array<i64: 1, 128>}, {transform_indices = @transform_7, window_bounds = array<i64: 8, 128>}]} {
    %c0 = arith.constant 0 : index
    %c0_0 = arith.constant 0 : index
    %0 = vector.load %arg1[%c0, %c0_0] : memref<8x128xf32, #tpu.memory_space<vmem>>, vector<8x128xf32>
    %c0_1 = arith.constant 0 : index
    %c0_2 = arith.constant 0 : index
    %1 = vector.load %arg2[%c0_1, %c0_2] : memref<128x512xf32, #tpu.memory_space<vmem>>, vector<128x512xf32>
    %cst = arith.constant dense<0.000000e+00> : vector<8x512xf32>
    %2 = tpu.matmul %0, %1, %cst {dimension_numbers = #tpu.dot_dimension_numbers<[1], [0], [0], [1], [0, 0, 1, 1], [], []>} : vector<8x128xf32>, vector<128x512xf32>, vector<8x512xf32> -> vector<8x512xf32>
    %c0_3 = arith.constant 0 : index
    %c0_4 = arith.constant 0 : index
    %3 = vector.load %arg3[%c0_3, %c0_4] : memref<1x512xf32, #tpu.memory_space<vmem>>, vector<1x512xf32>
    %4 = vector.broadcast %3 : vector<1x512xf32> to vector<8x512xf32>
    %5 = arith.addf %2, %4 : vector<8x512xf32>
    %cst_5 = arith.constant 0.000000e+00 : f32
    %6 = vector.broadcast %cst_5 : f32 to vector<8x512xf32>
    %7 = arith.maximumf %5, %6 : vector<8x512xf32>
    %c0_6 = arith.constant 0 : index
    %c0_7 = arith.constant 0 : index
    %8 = vector.load %arg4[%c0_6, %c0_7] : memref<512x512xf32, #tpu.memory_space<vmem>>, vector<512x512xf32>
    %cst_8 = arith.constant dense<0.000000e+00> : vector<8x512xf32>
    %9 = tpu.matmul %7, %8, %cst_8 {dimension_numbers = #tpu.dot_dimension_numbers<[1], [0], [0], [1], [0, 0, 1, 1], [], []>} : vector<8x512xf32>, vector<512x512xf32>, vector<8x512xf32> -> vector<8x512xf32>
    %c0_9 = arith.constant 0 : index
    %c0_10 = arith.constant 0 : index
    %10 = vector.load %arg5[%c0_9, %c0_10] : memref<1x512xf32, #tpu.memory_space<vmem>>, vector<1x512xf32>
    %11 = vector.broadcast %10 : vector<1x512xf32> to vector<8x512xf32>
    %12 = arith.addf %9, %11 : vector<8x512xf32>
    %cst_11 = arith.constant 0.000000e+00 : f32
    %13 = vector.broadcast %cst_11 : f32 to vector<8x512xf32>
    %14 = arith.maximumf %12, %13 : vector<8x512xf32>
    %c0_12 = arith.constant 0 : index
    %c0_13 = arith.constant 0 : index
    %15 = vector.load %arg6[%c0_12, %c0_13] : memref<512x128xf32, #tpu.memory_space<vmem>>, vector<512x128xf32>
    %cst_14 = arith.constant dense<0.000000e+00> : vector<8x128xf32>
    %16 = tpu.matmul %14, %15, %cst_14 {dimension_numbers = #tpu.dot_dimension_numbers<[1], [0], [0], [1], [0, 0, 1, 1], [], []>} : vector<8x512xf32>, vector<512x128xf32>, vector<8x128xf32> -> vector<8x128xf32>
    %c0_15 = arith.constant 0 : index
    %c0_16 = arith.constant 0 : index
    %17 = vector.load %arg7[%c0_15, %c0_16] : memref<1x128xf32, #tpu.memory_space<vmem>>, vector<1x128xf32>
    %18 = vector.broadcast %17 : vector<1x128xf32> to vector<8x128xf32>
    %19 = arith.addf %16, %18 : vector<8x128xf32>
    %c0_17 = arith.constant 0 : index
    %c0_18 = arith.constant 0 : index
    %20 = vector.load %arg8[%c0_17, %c0_18] : memref<8x128xf32, #tpu.memory_space<vmem>>, vector<8x128xf32>
    tpu.vector_store %arg8[%c0_17, %c0_18], %19 {strides = array<i32>} : memref<8x128xf32, #tpu.memory_space<vmem>>, vector<8x128xf32>,
    return
  }
  func.func @transform_0(%arg0: i32) -> (i32, i32) {
    %c0_i32 = arith.constant 0 : i32
    %c0_i32_0 = arith.constant 0 : i32
    return %arg0, %c0_i32 : i32, i32
  }
  func.func @transform_1(%arg0: i32) -> (i32, i32) {
    %c0_i32 = arith.constant 0 : i32
    %c0_i32_0 = arith.constant 0 : i32
    %c0_i32_1 = arith.constant 0 : i32
    return %c0_i32, %c0_i32_0 : i32, i32
  }
  func.func @transform_2(%arg0: i32) -> (i32, i32) {
    %c0_i32 = arith.constant 0 : i32
    %c0_i32_0 = arith.constant 0 : i32
    %c0_i32_1 = arith.constant 0 : i32
    return %c0_i32, %c0_i32_0 : i32, i32
  }
  func.func @transform_3(%arg0: i32) -> (i32, i32) {
    %c0_i32 = arith.constant 0 : i32
    %c0_i32_0 = arith.constant 0 : i32
    %c0_i32_1 = arith.constant 0 : i32
    return %c0_i32, %c0_i32_0 : i32, i32
  }
  func.func @transform_4(%arg0: i32) -> (i32, i32) {
    %c0_i32 = arith.constant 0 : i32
    %c0_i32_0 = arith.constant 0 : i32
    %c0_i32_1 = arith.constant 0 : i32
    return %c0_i32, %c0_i32_0 : i32, i32
  }
  func.func @transform_5(%arg0: i32) -> (i32, i32) {
    %c0_i32 = arith.constant 0 : i32
    %c0_i32_0 = arith.constant 0 : i32
    %c0_i32_1 = arith.constant 0 : i32
    return %c0_i32, %c0_i32_0 : i32, i32
  }
  func.func @transform_6(%arg0: i32) -> (i32, i32) {
    %c0_i32 = arith.constant 0 : i32
    %c0_i32_0 = arith.constant 0 : i32
    %c0_i32_1 = arith.constant 0 : i32
    return %c0_i32, %c0_i32_0 : i32, i32
  }
  func.func @transform_7(%arg0: i32) -> (i32, i32) {
    %c0_i32 = arith.constant 0 : i32
    %c0_i32_0 = arith.constant 0 : i32
    return %arg0, %c0_i32 : i32, i32
  }
}

</mosaic_0001>

<bundles_post_ra>
// kernel: ad_mlp_forward.1
= control target key start
LH: loop header
LB: loop body
LE: loop exit
PB: predicated region body
PF: predicated region fallthrough
CT: control target
= control target key end

     0   :  { %v1505_v3 = vmov 0.0   ;;  %s2748_s1 = inlined_call_operand.vmem [shape: f32[128,512], index: 1, kind: input, shape index: {}]   ;;  %s2749_s3 = inlined_call_operand.vmem [shape: f32[512,512], index: 3, kind: input, shape index: {}]   ;;  %s2750_s0 = inlined_call_operand.vmem [shape: f32[8,128], index: 0, kind: input, shape index: {}]   ;;  %s2751_s2 = inlined_call_operand.vmem [shape: f32[1,512], index: 2, kind: input, shape index: {}]   ;;  %s2752_s5 = inlined_call_operand.vmem [shape: f32[512,128], index: 5, kind: input, shape index: {}]   ;;  %s2753_s4 = inlined_call_operand.vmem [shape: f32[1,512], index: 4, kind: input, shape index: {}]   ;;  %s2754_s6 = inlined_call_operand.vmem [shape: f32[1,128], index: 6, kind: input, shape index: {}]   ;;  %s2755_s7 = inlined_call_operand.vmem [shape: f32[8,128], index: 7, kind: output, shape index: {}]  }
   0x1   :  { %v28_v0 = vld [vmem:[%s2748_s1 + $0x8] sm:$0xff]  ;;  %v27_v2 = vld [vmem:[%s2748_s1] sm:$0xff]  ;;  %177 = vmatprep.mubr.f32.mxu0 %v1505_v3  ;;  %248 = vmatprep.mubr.f32.mxu1 %v1505_v3  ;;  %v30_v28 = vld [vmem:[%s2748_s1 + $0x18] sm:$0xff] }
   0x2   :  { %v32_v1 = vld [vmem:[%s2748_s1 + $0x28] sm:$0xff]  ;;  %v31_v5 = vld [vmem:[%s2748_s1 + $0x20] sm:$0xff]  ;;  %v34_v29 = vld [vmem:[%s2748_s1 + $0x38] sm:$0xff] }
   0x3   :  { %v1112_v4 = vpack.c.bf16 %v32_v1, %v28_v0  ;;  %v36_v6 = vld [vmem:[%s2748_s1 + $0x48] sm:$0xff]  ;;  %v1114_v8 = vpack.c.bf16 %v31_v5, %v27_v2  ;;  %v35_v10 = vld [vmem:[%s2748_s1 + $0x40] sm:$0xff]  ;;  %v29_v30 = vld [vmem:[%s2748_s1 + $0x10] sm:$0xff]  ;;  %v1144_v32 = vpack.c.bf16 %v34_v29, %v30_v28 }
   0x4   :  { %v40_v7 = vld [vmem:[%s2748_s1 + $0x68] sm:$0xff]  ;;  %v39_v11 = vld [vmem:[%s2748_s1 + $0x60] sm:$0xff]  ;;  %v33_v33 = vld [vmem:[%s2748_s1 + $0x30] sm:$0xff] }
   0x5   :  { %v1116_v9 = vpack.c.bf16 %v40_v7, %v36_v6  ;;  %v44_v12 = vld [vmem:[%s2748_s1 + $0x88] sm:$0xff]  ;;  %1113 = vmatprep.subr.bf16.mxu0 %v1112_v4  ;;  %v1118_v14 = vpack.c.bf16 %v39_v11, %v35_v10  ;;  %v43_v16 = vld [vmem:[%s2748_s1 + $0x80] sm:$0xff]  ;;  %v38_v34 = vld [vmem:[%s2748_s1 + $0x58] sm:$0xff]  ;;  %v1146_v37 = vpack.c.bf16 %v33_v33, %v29_v30  ;;  %1145 = vmatprep.subr.bf16.mxu1 %v1144_v32 }
   0x6   :  { %v48_v13 = vld [vmem:[%s2748_s1 + $0xa8] sm:$0xff]  ;;  %1115 = vmatpush1.bf16.msra.mxu0 %v1114_v8  ;;  %v47_v17 = vld [vmem:[%s2748_s1 + $0xa0] sm:$0xff]  ;;  %v42_v35 = vld [vmem:[%s2748_s1 + $0x78] sm:$0xff] }
   0x7   :  { %1117 = vmatprep.subr.bf16.mxu0 %v1116_v9  ;;  %v1120_v15 = vpack.c.bf16 %v48_v13, %v44_v12  ;;  %v52_v18 = vld [vmem:[%s2748_s1 + $0xc8] sm:$0xff]  ;;  %v1122_v20 = vpack.c.bf16 %v47_v17, %v43_v16  ;;  %v51_v22 = vld [vmem:[%s2748_s1 + $0xc0] sm:$0xff]  ;;  %v1148_v38 = vpack.c.bf16 %v42_v35, %v38_v34  ;;  %v37_v39 = vld [vmem:[%s2748_s1 + $0x50] sm:$0xff]  ;;  %1147 = vmatpush1.bf16.msra.mxu1 %v1146_v37 }
   0x8   :  { %v56_v19 = vld [vmem:[%s2748_s1 + $0xe8] sm:$0xff]  ;;  %v55_v23 = vld [vmem:[%s2748_s1 + $0xe0] sm:$0xff]  ;;  %v41_v40 = vld [vmem:[%s2748_s1 + $0x70] sm:$0xff] }
   0x9   :  { %v1124_v21 = vpack.c.bf16 %v56_v19, %v52_v18  ;;  %v60_v24 = vld [vmem:[%s2748_s1 + $0x108] sm:$0xff]  ;;  %v59_v26 = vld [vmem:[%s2748_s1 + $0x100] sm:$0xff]  ;;  %v1126_v31 = vpack.c.bf16 %v55_v23, %v51_v22  ;;  %v46_v41 = vld [vmem:[%s2748_s1 + $0x98] sm:$0xff]  ;;  %v1150_v45 = vpack.c.bf16 %v41_v40, %v37_v39  ;;  %1149 = vmatprep.subr.bf16.mxu1 %v1148_v38 }
   0xa   :  { %1119 = vmatpush1.bf16.msra.mxu0 %v1118_v14  ;;  %v64_v25 = vld [vmem:[%s2748_s1 + $0x128] sm:$0xff]  ;;  %v63_v27 = vld [vmem:[%s2748_s1 + $0x120] sm:$0xff]  ;;  %v50_v44 = vld [vmem:[%s2748_s1 + $0xb8] sm:$0xff] }
   0xb   :  { %1121 = vmatprep.subr.bf16.mxu0 %v1120_v15  ;;  %v1128_v36 = vpack.c.bf16 %v64_v25, %v60_v24  ;;  %v68_v42 = vld [vmem:[%s2748_s1 + $0x148] sm:$0xff]  ;;  %v1130_v46 = vpack.c.bf16 %v63_v27, %v59_v26  ;;  %v67_v47 = vld [vmem:[%s2748_s1 + $0x140] sm:$0xff]  ;;  %v1152_v48 = vpack.c.bf16 %v50_v44, %v46_v41  ;;  %v45_v49 = vld [vmem:[%s2748_s1 + $0x90] sm:$0xff]  ;;  %1151 = vmatpush1.bf16.msra.mxu1 %v1150_v45 }
   0xc   :  { %v72_v43 = vld [vmem:[%s2748_s1 + $0x168] sm:$0xff]  ;;  %v49_v50 = vld [vmem:[%s2748_s1 + $0xb0] sm:$0xff]  ;;  %v71_v52 = vld [vmem:[%s2748_s1 + $0x160] sm:$0xff] }
   0xd   :  { %v1132_v51 = vpack.c.bf16 %v72_v43, %v68_v42  ;;  %v54_v53 = vld [vmem:[%s2748_s1 + $0xd8] sm:$0xff]  ;;  %v76_v55 = vld [vmem:[%s2748_s1 + $0x188] sm:$0xff]  ;;  %v1154_v57 = vpack.c.bf16 %v49_v50, %v45_v49  ;;  %v1134_v58 = vpack.c.bf16 %v71_v52, %v67_v47  ;;  %v75_v59 = vld [vmem:[%s2748_s1 + $0x180] sm:$0xff]  ;;  %1153 = vmatprep.subr.bf16.mxu1 %v1152_v48 }
   0xe   :  { %1123 = vmatpush1.bf16.msra.mxu0 %v1122_v20  ;;  %v58_v54 = vld [vmem:[%s2748_s1 + $0xf8] sm:$0xff]  ;;  %v80_v56 = vld [vmem:[%s2748_s1 + $0x1a8] sm:$0xff]  ;;  %v53_v61 = vld [vmem:[%s2748_s1 + $0xd0] sm:$0xff] }
   0xf   :  { %1125 = vmatprep.subr.bf16.mxu0 %v1124_v21  ;;  %v1156_v60 = vpack.c.bf16 %v58_v54, %v54_v53  ;;  %v57_v62 = vld [vmem:[%s2748_s1 + $0xf0] sm:$0xff]  ;;  %v1136_v63 = vpack.c.bf16 %v80_v56, %v76_v55  ;;  %v79_v0 = vld [vmem:[%s2748_s1 + $0x1a0] sm:$0xff]  ;;  %v62_v1 = vld [vmem:[%s2748_s1 + $0x118] sm:$0xff]  ;;  %1155 = vmatpush1.bf16.msra.mxu1 %v1154_v57 }
  0x10   :  { %v66_v2 = vld [vmem:[%s2748_s1 + $0x138] sm:$0xff]  ;;  %v84_v3 = vld [vmem:[%s2748_s1 + $0x1c8] sm:$0xff]  ;;  %v1158_v5 = vpack.c.bf16 %v57_v62, %v53_v61  ;;  %v1138_v6 = vpack.c.bf16 %v79_v0, %v75_v59  ;;  %v83_v7 = vld [vmem:[%s2748_s1 + $0x1c0] sm:$0xff] }
  0x11   :  { %v88_v4 = vld [vmem:[%s2748_s1 + $0x1e8] sm:$0xff]  ;;  %1157 = vmatprep.subr.bf16.mxu1 %v1156_v60  ;;  %v1160_v8 = vpack.c.bf16 %v66_v2, %v62_v1  ;;  %v61_v9 = vld [vmem:[%s2748_s1 + $0x110] sm:$0xff]  ;;  %v87_v12 = vld [vmem:[%s2748_s1 + $0x1e0] sm:$0xff] }
  0x12   :  { %1127 = vmatpush1.bf16.msra.mxu0 %v1126_v31  ;;  %v65_v10 = vld [vmem:[%s2748_s1 + $0x130] sm:$0xff]  ;;  %v1140_v11 = vpack.c.bf16 %v88_v4, %v84_v3  ;;  %v70_v13 = vld [vmem:[%s2748_s1 + $0x158] sm:$0xff]  ;;  %v260_v15 = vld [vmem:[%s2749_s3 + $0x8] sm:$0xff]  ;;  %v1142_v18 = vpack.c.bf16 %v87_v12, %v83_v7 }
  0x13   :  { %1129 = vmatprep.subr.bf16.mxu0 %v1128_v36  ;;  %v74_v14 = vld [vmem:[%s2748_s1 + $0x178] sm:$0xff]  ;;  %v264_v16 = vld [vmem:[%s2749_s3 + $0x28] sm:$0xff]  ;;  %1159 = vmatpush1.bf16.msra.mxu1 %v1158_v5  ;;  %v1162_v17 = vpack.c.bf16 %v65_v10, %v61_v9  ;;  %v69_v20 = vld [vmem:[%s2748_s1 + $0x150] sm:$0xff] }
  0x14   :  { %1161 = vmatprep.subr.bf16.mxu1 %v1160_v8  ;;  %v1164_v19 = vpack.c.bf16 %v74_v14, %v70_v13  ;;  %v73_v21 = vld [vmem:[%s2748_s1 + $0x170] sm:$0xff]  ;;  %v78_v22 = vld [vmem:[%s2748_s1 + $0x198] sm:$0xff]  ;;  %v1176_v24 = vpack.c.bf16 %v264_v16, %v260_v15  ;;  %v259_v25 = vld [vmem:[%s2749_s3] sm:$0xff] }
  0x15   :  { %v82_v23 = vld [vmem:[%s2748_s1 + $0x1b8] sm:$0xff]  ;;  %v263_v26 = vld [vmem:[%s2749_s3 + $0x20] sm:$0xff]  ;;  %v268_v27 = vld [vmem:[%s2749_s3 + $0x48] sm:$0xff]  ;;  %v1166_v30 = vpack.c.bf16 %v73_v21, %v69_v20 }
  0x16   :  { %1131 = vmatpush1.bf16.msra.mxu0 %v1130_v46  ;;  %v272_v28 = vld [vmem:[%s2749_s3 + $0x68] sm:$0xff]  ;;  %v1741_v29 = vld [vmem:[%s2750_s0] sm:$0xff]  ;;  %v1168_v31 = vpack.c.bf16 %v82_v23, %v78_v22  ;;  %v77_v32 = vld [vmem:[%s2748_s1 + $0x190] sm:$0xff]  ;;  %v1178_v35 = vpack.c.bf16 %v263_v26, %v259_v25 }
  0x17   :  { %1133 = vmatprep.subr.bf16.mxu0 %v1132_v51  ;;  %1163 = vmatpush1.bf16.msra.mxu1 %v1162_v17  ;;  %v81_v33 = vld [vmem:[%s2748_s1 + $0x1b0] sm:$0xff]  ;;  %v86_v34 = vld [vmem:[%s2748_s1 + $0x1d8] sm:$0xff]  ;;  %v1180_v37 = vpack.c.bf16 %v272_v28, %v268_v27  ;;  %v267_v38 = vld [vmem:[%s2749_s3 + $0x40] sm:$0xff] }
  0x18   :  { %1165 = vmatprep.subr.bf16.mxu1 %v1164_v19  ;;  %v90_v36 = vld [vmem:[%s2748_s1 + $0x1f8] sm:$0xff]  ;;  %v271_v39 = vld [vmem:[%s2749_s3 + $0x60] sm:$0xff]  ;;  %v276_v40 = vld [vmem:[%s2749_s3 + $0x88] sm:$0xff]  ;;  %v1170_v42 = vpack.c.bf16 %v81_v33, %v77_v32 }
  0x19   :  { %v280_v41 = vld [vmem:[%s2749_s3 + $0xa8] sm:$0xff]  ;;  %v1172_v43 = vpack.c.bf16 %v90_v36, %v86_v34  ;;  %v85_v44 = vld [vmem:[%s2748_s1 + $0x1d0] sm:$0xff]  ;;  %v262_v46 = vld [vmem:[%s2749_s3 + $0x18] sm:$0xff]  ;;  %v1182_v47 = vpack.c.bf16 %v271_v39, %v267_v38 }
  0x1a   :  { %1135 = vmatpush1.bf16.msra.mxu0 %v1134_v58  ;;  %v89_v45 = vld [vmem:[%s2748_s1 + $0x1f0] sm:$0xff]  ;;  %v266_v48 = vld [vmem:[%s2749_s3 + $0x38] sm:$0xff]  ;;  %v1184_v49 = vpack.c.bf16 %v280_v41, %v276_v40  ;;  %v275_v50 = vld [vmem:[%s2749_s3 + $0x80] sm:$0xff] }
  0x1b   :  { %1137 = vmatprep.subr.bf16.mxu0 %v1136_v63  ;;  %1167 = vmatpush1.bf16.msra.mxu1 %v1166_v30  ;;  %v279_v51 = vld [vmem:[%s2749_s3 + $0xa0] sm:$0xff]  ;;  %v284_v52 = vld [vmem:[%s2749_s3 + $0xc8] sm:$0xff]  ;;  %v1174_v54 = vpack.c.bf16 %v89_v45, %v85_v44  ;;  %v1304_v55 = vpack.c.bf16 %v266_v48, %v262_v46  ;;  %v261_v56 = vld [vmem:[%s2749_s3 + $0x10] sm:$0xff] }
  0x1c   :  { %1169 = vmatprep.subr.bf16.mxu1 %v1168_v31  ;;  %v288_v53 = vld [vmem:[%s2749_s3 + $0xe8] sm:$0xff]  ;;  %v265_v57 = vld [vmem:[%s2749_s3 + $0x30] sm:$0xff]  ;;  %v270_v58 = vld [vmem:[%s2749_s3 + $0x58] sm:$0xff]  ;;  %v1186_v59 = vpack.c.bf16 %v279_v51, %v275_v50 }
  0x1d   :  { %v274_v60 = vld [vmem:[%s2749_s3 + $0x78] sm:$0xff]  ;;  %v1188_v61 = vpack.c.bf16 %v288_v53, %v284_v52  ;;  %v283_v62 = vld [vmem:[%s2749_s3 + $0xc0] sm:$0xff]  ;;  %v292_v0 = vld [vmem:[%s2749_s3 + $0x108] sm:$0xff]  ;;  %v1306_v2 = vpack.c.bf16 %v265_v57, %v261_v56 }
  0x1e   :  { %1139 = vmatpush1.bf16.msra.mxu0 %v1138_v6  ;;  %v287_v63 = vld [vmem:[%s2749_s3 + $0xe0] sm:$0xff]  ;;  %v296_v1 = vld [vmem:[%s2749_s3 + $0x128] sm:$0xff]  ;;  %v1308_v3 = vpack.c.bf16 %v274_v60, %v270_v58  ;;  %v269_v4 = vld [vmem:[%s2749_s3 + $0x50] sm:$0xff] }
  0x1f   :  { %1141 = vmatprep.subr.bf16.mxu0 %v1140_v11  ;;  %1171 = vmatpush1.bf16.msra.mxu1 %v1170_v42  ;;  %v273_v5 = vld [vmem:[%s2749_s3 + $0x70] sm:$0xff]  ;;  %v278_v6 = vld [vmem:[%s2749_s3 + $0x98] sm:$0xff]  ;;  %v1190_v7 = vpack.c.bf16 %v287_v63, %v283_v62  ;;  %v1192_v9 = vpack.c.bf16 %v296_v1, %v292_v0  ;;  %v291_v10 = vld [vmem:[%s2749_s3 + $0x100] sm:$0xff] }
  0x20   :  { %1173 = vmatprep.subr.bf16.mxu1 %v1172_v43  ;;  %v282_v8 = vld [vmem:[%s2749_s3 + $0xb8] sm:$0xff]  ;;  %v295_v11 = vld [vmem:[%s2749_s3 + $0x120] sm:$0xff]  ;;  %v300_v12 = vld [vmem:[%s2749_s3 + $0x148] sm:$0xff]  ;;  %v1310_v14 = vpack.c.bf16 %v273_v5, %v269_v4 }
  0x21   :  { %v304_v13 = vld [vmem:[%s2749_s3 + $0x168] sm:$0xff]  ;;  %v1312_v15 = vpack.c.bf16 %v282_v8, %v278_v6  ;;  %v277_v16 = vld [vmem:[%s2749_s3 + $0x90] sm:$0xff]  ;;  %v1194_v19 = vpack.c.bf16 %v295_v11, %v291_v10  ;;  %v290_v20 = vld [vmem:[%s2749_s3 + $0xf8] sm:$0xff] }
  0x22   :  { %1143 = vmatpush1.bf16.msra.mxu0 %v1142_v18  ;;  %v281_v17 = vld [vmem:[%s2749_s3 + $0xb0] sm:$0xff]  ;;  %v286_v18 = vld [vmem:[%s2749_s3 + $0xd8] sm:$0xff]  ;;  %v1196_v21 = vpack.c.bf16 %v304_v13, %v300_v12  ;;  %v299_v22 = vld [vmem:[%s2749_s3 + $0x140] sm:$0xff] }
  0x23   :  { %1177 = vmatprep.subr.bf16.mxu0 %v1176_v24  ;;  %1175 = vmatpush1.bf16.msra.mxu1 %v1174_v54  ;;  %v303_v23 = vld [vmem:[%s2749_s3 + $0x160] sm:$0xff]  ;;  %v308_v24 = vld [vmem:[%s2749_s3 + $0x188] sm:$0xff]  ;;  %v1314_v26 = vpack.c.bf16 %v281_v17, %v277_v16  ;;  %v1316_v27 = vpack.c.bf16 %v290_v20, %v286_v18  ;;  %v285_v28 = vld [vmem:[%s2749_s3 + $0xd0] sm:$0xff] }
  0x24   :  { %1305 = vmatprep.subr.bf16.mxu1 %v1304_v55  ;;  %v312_v25 = vld [vmem:[%s2749_s3 + $0x1a8] sm:$0xff]  ;;  %v294_v30 = vld [vmem:[%s2749_s3 + $0x118] sm:$0xff]  ;;  %v1198_v31 = vpack.c.bf16 %v303_v23, %v299_v22  ;;  %v307_v34 = vld [vmem:[%s2749_s3 + $0x180] sm:$0xff] }
  0x25   :  { %178 = vmatmul.mubr.f32.vlgmr.msra.gmra.mrb[0].mxu0 %v1741_v29  ;;  %v298_v32 = vld [vmem:[%s2749_s3 + $0x138] sm:$0xff]  ;;  %v1200_v33 = vpack.c.bf16 %v312_v25, %v308_v24  ;;  %v316_v36 = vld [vmem:[%s2749_s3 + $0x1c8] sm:$0xff]  ;;  %v293_v40 = vld [vmem:[%s2749_s3 + $0x110] sm:$0xff] }
  0x26   :  { %1179 = vmatpush1.bf16.msra.mxu0 %v1178_v35  ;;  %249 = vmatmul.mubr.f32.vlgmr.msra.gmra.mrb[0].mxu1 %v1741_v29  ;;  %v289_v29 = vld [vmem:[%s2749_s3 + $0xf0] sm:$0xff]  ;;  %v311_v35 = vld [vmem:[%s2749_s3 + $0x1a0] sm:$0xff]  ;;  %v1320_v39 = vpack.c.bf16 %v298_v32, %v294_v30  ;;  %v302_v42 = vld [vmem:[%s2749_s3 + $0x158] sm:$0xff] }
  0x27   :  { %1181 = vmatprep.subr.bf16.mxu0 %v1180_v37  ;;  %1307 = vmatpush1.bf16.msra.mxu1 %v1306_v2  ;;  %v320_v37 = vld [vmem:[%s2749_s3 + $0x1e8] sm:$0xff]  ;;  %v1318_v38 = vpack.c.bf16 %v289_v29, %v285_v28  ;;  %v297_v41 = vld [vmem:[%s2749_s3 + $0x130] sm:$0xff]  ;;  %v1202_v43 = vpack.c.bf16 %v311_v35, %v307_v34  ;;  %v306_v44 = vld [vmem:[%s2749_s3 + $0x178] sm:$0xff] }
  0x28   :  { %1309 = vmatprep.subr.bf16.mxu1 %v1308_v3  ;;  %v1204_v45 = vpack.c.bf16 %v320_v37, %v316_v36  ;;  %v315_v46 = vld [vmem:[%s2749_s3 + $0x1c0] sm:$0xff]  ;;  %v324_v48 = vld [vmem:[%s2749_s3 + $0x208] sm:$0xff]  ;;  %v1322_v50 = vpack.c.bf16 %v297_v41, %v293_v40  ;;  %v1324_v51 = vpack.c.bf16 %v306_v44, %v302_v42  ;;  %v301_v52 = vld [vmem:[%s2749_s3 + $0x150] sm:$0xff] }
  0x29   :  { %v305_v53 = vld [vmem:[%s2749_s3 + $0x170] sm:$0xff]  ;;  %v310_v54 = vld [vmem:[%s2749_s3 + $0x198] sm:$0xff]  ;;  %v323_v58 = vld [vmem:[%s2749_s3 + $0x200] sm:$0xff] }
  0x2a   :  { %1183 = vmatpush1.bf16.msra.mxu0 %v1182_v47  ;;  %v319_v47 = vld [vmem:[%s2749_s3 + $0x1e0] sm:$0xff]  ;;  %v314_v56 = vld [vmem:[%s2749_s3 + $0x1b8] sm:$0xff]  ;;  %v332_v60 = vld [vmem:[%s2749_s3 + $0x248] sm:$0xff]  ;;  %v1326_v62 = vpack.c.bf16 %v305_v53, %v301_v52 }
  0x2b   :  { %1185 = vmatprep.subr.bf16.mxu0 %v1184_v49  ;;  %1311 = vmatpush1.bf16.msra.mxu1 %v1310_v14  ;;  %v328_v49 = vld [vmem:[%s2749_s3 + $0x228] sm:$0xff]  ;;  %v1206_v55 = vpack.c.bf16 %v319_v47, %v315_v46  ;;  %v1328_v63 = vpack.c.bf16 %v314_v56, %v310_v54  ;;  %v309_v0 = vld [vmem:[%s2749_s3 + $0x190] sm:$0xff]  ;;  %v318_v2 = vld [vmem:[%s2749_s3 + $0x1d8] sm:$0xff] }
  0x2c   :  { %1313 = vmatprep.subr.bf16.mxu1 %v1312_v15  ;;  %v1208_v57 = vpack.c.bf16 %v328_v49, %v324_v48  ;;  %v313_v1 = vld [vmem:[%s2749_s3 + $0x1b0] sm:$0xff]  ;;  %v322_v4 = vld [vmem:[%s2749_s3 + $0x1f8] sm:$0xff]  ;;  %v331_v6 = vld [vmem:[%s2749_s3 + $0x240] sm:$0xff] }
  0x2d   :  { %v340_v8 = vld [vmem:[%s2749_s3 + $0x288] sm:$0xff]  ;;  %v1330_v10 = vpack.c.bf16 %v313_v1, %v309_v0  ;;  %v1332_v11 = vpack.c.bf16 %v322_v4, %v318_v2  ;;  %v317_v12 = vld [vmem:[%s2749_s3 + $0x1d0] sm:$0xff]  ;;  %v326_v14 = vld [vmem:[%s2749_s3 + $0x218] sm:$0xff] }
  0x2e   :  { %1187 = vmatpush1.bf16.msra.mxu0 %v1186_v59  ;;  %v327_v59 = vld [vmem:[%s2749_s3 + $0x220] sm:$0xff]  ;;  %v321_v13 = vld [vmem:[%s2749_s3 + $0x1f0] sm:$0xff]  ;;  %v330_v16 = vld [vmem:[%s2749_s3 + $0x238] sm:$0xff] }
  0x2f   :  { %1189 = vmatprep.subr.bf16.mxu0 %v1188_v61  ;;  %1315 = vmatpush1.bf16.msra.mxu1 %v1314_v26  ;;  %v336_v61 = vld [vmem:[%s2749_s3 + $0x268] sm:$0xff]  ;;  %v1210_v3 = vpack.c.bf16 %v327_v59, %v323_v58  ;;  %v339_v18 = vld [vmem:[%s2749_s3 + $0x280] sm:$0xff]  ;;  %v1334_v22 = vpack.c.bf16 %v321_v13, %v317_v12  ;;  %v1336_v23 = vpack.c.bf16 %v330_v16, %v326_v14  ;;  %v325_v24 = vld [vmem:[%s2749_s3 + $0x210] sm:$0xff] }
  0x30   :  { %1317 = vmatprep.subr.bf16.mxu1 %v1316_v27  ;;  %v1212_v5 = vpack.c.bf16 %v336_v61, %v332_v60  ;;  %v348_v20 = vld [vmem:[%s2749_s3 + $0x2c8] sm:$0xff]  ;;  %v329_v25 = vld [vmem:[%s2749_s3 + $0x230] sm:$0xff]  ;;  %v334_v26 = vld [vmem:[%s2749_s3 + $0x258] sm:$0xff] }
  0x31   :  { %v338_v28 = vld [vmem:[%s2749_s3 + $0x278] sm:$0xff]  ;;  %v347_v30 = vld [vmem:[%s2749_s3 + $0x2c0] sm:$0xff]  ;;  %v356_v32 = vld [vmem:[%s2749_s3 + $0x308] sm:$0xff]  ;;  %v1338_v34 = vpack.c.bf16 %v329_v25, %v325_v24 }
  0x32   :  { %1191 = vmatpush1.bf16.msra.mxu0 %v1190_v7  ;;  %v335_v7 = vld [vmem:[%s2749_s3 + $0x260] sm:$0xff]  ;;  %v1340_v35 = vpack.c.bf16 %v338_v28, %v334_v26  ;;  %v333_v36 = vld [vmem:[%s2749_s3 + $0x250] sm:$0xff]  ;;  %v346_v40 = vld [vmem:[%s2749_s3 + $0x2b8] sm:$0xff] }
  0x33   :  { %1193 = vmatprep.subr.bf16.mxu0 %v1192_v9  ;;  %1319 = vmatpush1.bf16.msra.mxu1 %v1318_v38  ;;  %v344_v9 = vld [vmem:[%s2749_s3 + $0x2a8] sm:$0xff]  ;;  %v1214_v15 = vpack.c.bf16 %v335_v7, %v331_v6  ;;  %v337_v37 = vld [vmem:[%s2749_s3 + $0x270] sm:$0xff]  ;;  %v342_v38 = vld [vmem:[%s2749_s3 + $0x298] sm:$0xff] }
  0x34   :  { %1321 = vmatprep.subr.bf16.mxu1 %v1320_v39  ;;  %v1216_v17 = vpack.c.bf16 %v344_v9, %v340_v8  ;;  %v355_v42 = vld [vmem:[%s2749_s3 + $0x300] sm:$0xff]  ;;  %v364_v44 = vld [vmem:[%s2749_s3 + $0x348] sm:$0xff]  ;;  %v1342_v46 = vpack.c.bf16 %v337_v37, %v333_v36  ;;  %v1344_v47 = vpack.c.bf16 %v346_v40, %v342_v38  ;;  %v341_v48 = vld [vmem:[%s2749_s3 + $0x290] sm:$0xff]  ;;  %v93_v40 = vlaneseq }
  0x35   :  { %v345_v49 = vld [vmem:[%s2749_s3 + $0x2b0] sm:$0xff]  ;;  %v354_v52 = vld [vmem:[%s2749_s3 + $0x2f8] sm:$0xff]  ;;  %v363_v54 = vld [vmem:[%s2749_s3 + $0x340] sm:$0xff] }
  0x36   :  { %1195 = vmatpush1.bf16.msra.mxu0 %v1194_v19  ;;  %v343_v19 = vld [vmem:[%s2749_s3 + $0x2a0] sm:$0xff]  ;;  %v372_v56 = vld [vmem:[%s2749_s3 + $0x388] sm:$0xff]  ;;  %v1346_v58 = vpack.c.bf16 %v345_v49, %v341_v48  ;;  %v349_v60 = vld [vmem:[%s2749_s3 + $0x2d0] sm:$0xff] }
  0x37   :  { %1197 = vmatprep.subr.bf16.mxu0 %v1196_v21  ;;  %1323 = vmatpush1.bf16.msra.mxu1 %v1322_v50  ;;  %v352_v21 = vld [vmem:[%s2749_s3 + $0x2e8] sm:$0xff]  ;;  %v1218_v27 = vpack.c.bf16 %v343_v19, %v339_v18  ;;  %v350_v50 = vld [vmem:[%s2749_s3 + $0x2d8] sm:$0xff]  ;;  %v353_v61 = vld [vmem:[%s2749_s3 + $0x2f0] sm:$0xff] }
  0x38   :  { %1325 = vmatprep.subr.bf16.mxu1 %v1324_v51  ;;  %v1220_v29 = vpack.c.bf16 %v352_v21, %v348_v20  ;;  %v1348_v59 = vpack.c.bf16 %v354_v52, %v350_v50  ;;  %v362_v0 = vld [vmem:[%s2749_s3 + $0x338] sm:$0xff]  ;;  %v371_v2 = vld [vmem:[%s2749_s3 + $0x380] sm:$0xff]  ;;  %v1350_v4 = vpack.c.bf16 %v353_v61, %v349_v60  ;;  %v357_v6 = vld [vmem:[%s2749_s3 + $0x310] sm:$0xff] }
  0x39   :  { %v361_v7 = vld [vmem:[%s2749_s3 + $0x330] sm:$0xff]  ;;  %v366_v9 = vld [vmem:[%s2749_s3 + $0x358] sm:$0xff]  ;;  %v383_v28 = vld [vmem:[%s2749_s3 + $0x3e0] sm:$0xff] }
  0x3a   :  { %1199 = vmatpush1.bf16.msra.mxu0 %v1198_v31  ;;  %v351_v31 = vld [vmem:[%s2749_s3 + $0x2e0] sm:$0xff]  ;;  %v365_v13 = vld [vmem:[%s2749_s3 + $0x350] sm:$0xff]  ;;  %v378_v16 = vld [vmem:[%s2749_s3 + $0x3b8] sm:$0xff] }
  0x3b   :  { %1201 = vmatprep.subr.bf16.mxu0 %v1200_v33  ;;  %1327 = vmatpush1.bf16.msra.mxu1 %v1326_v62  ;;  %v360_v33 = vld [vmem:[%s2749_s3 + $0x328] sm:$0xff]  ;;  %v1222_v39 = vpack.c.bf16 %v351_v31, %v347_v30  ;;  %v358_v62 = vld [vmem:[%s2749_s3 + $0x318] sm:$0xff]  ;;  %v369_v14 = vld [vmem:[%s2749_s3 + $0x370] sm:$0xff] }
  0x3c   :  { %1329 = vmatprep.subr.bf16.mxu1 %v1328_v63  ;;  %v1224_v41 = vpack.c.bf16 %v360_v33, %v356_v32  ;;  %v373_v19 = vld [vmem:[%s2749_s3 + $0x390] sm:$0xff]  ;;  %v382_v24 = vld [vmem:[%s2749_s3 + $0x3d8] sm:$0xff]  ;;  %v387_v48 = vld [vmem:[%s2749_s3 + $0x400] sm:$0xff] }
  0x3d   :  { %v377_v20 = vld [vmem:[%s2749_s3 + $0x3b0] sm:$0xff]  ;;  %v386_v26 = vld [vmem:[%s2749_s3 + $0x3f8] sm:$0xff]  ;;  %v391_v49 = vld [vmem:[%s2749_s3 + $0x420] sm:$0xff] }
  0x3e   :  { %1203 = vmatpush1.bf16.msra.mxu0 %v1202_v43  ;;  %v359_v43 = vld [vmem:[%s2749_s3 + $0x320] sm:$0xff]  ;;  %v1362_v21 = vpack.c.bf16 %v377_v20, %v373_v19  ;;  %v381_v31 = vld [vmem:[%s2749_s3 + $0x3d0] sm:$0xff]  ;;  %v390_v36 = vld [vmem:[%s2749_s3 + $0x418] sm:$0xff]  ;;  %v1242_v60 = vpack.c.bf16 %v391_v49, %v387_v48 }
  0x3f   :  { %1205 = vmatprep.subr.bf16.mxu0 %v1204_v45  ;;  %1331 = vmatpush1.bf16.msra.mxu1 %v1330_v10  ;;  %v368_v45 = vld [vmem:[%s2749_s3 + $0x368] sm:$0xff]  ;;  %v1226_v51 = vpack.c.bf16 %v359_v43, %v355_v42  ;;  %v370_v10 = vld [vmem:[%s2749_s3 + $0x378] sm:$0xff]  ;;  %v385_v32 = vld [vmem:[%s2749_s3 + $0x3f0] sm:$0xff] }
  0x40   :  { %1333 = vmatprep.subr.bf16.mxu1 %v1332_v11  ;;  %v1228_v53 = vpack.c.bf16 %v368_v45, %v364_v44  ;;  %v1354_v11 = vpack.c.bf16 %v361_v7, %v357_v6  ;;  %v1356_v12 = vpack.c.bf16 %v370_v10, %v366_v9  ;;  %v1366_v33 = vpack.c.bf16 %v385_v32, %v381_v31  ;;  %v394_v38 = vld [vmem:[%s2749_s3 + $0x438] sm:$0xff]  ;;  %v2147_v43 = vld [vmem:[%s2751_s2] sm:$0xf]  ;;  %v389_v52 = vld [vmem:[%s2749_s3 + $0x410] sm:$0xff] }
  0x41   :  { %v408_v7 = vld [vmem:[%s2749_s3 + $0x4a8] sm:$0xff]  ;;  %v410_v9 = vld [vmem:[%s2749_s3 + $0x4b8] sm:$0xff]  ;;  %v413_v31 = vld [vmem:[%s2749_s3 + $0x4d0] sm:$0xff] }
  0x42   :  { %1207 = vmatpush1.bf16.msra.mxu0 %v1206_v55  ;;  %v367_v55 = vld [vmem:[%s2749_s3 + $0x360] sm:$0xff]  ;;  %v416_v20 = vld [vmem:[%s2749_s3 + $0x4e8] sm:$0xff]  ;;  %v417_v32 = vld [vmem:[%s2749_s3 + $0x4f0] sm:$0xff] }
  0x43   :  { %1209 = vmatprep.subr.bf16.mxu0 %v1208_v57  ;;  %1335 = vmatpush1.bf16.msra.mxu1 %v1334_v22  ;;  %v376_v57 = vld [vmem:[%s2749_s3 + $0x3a8] sm:$0xff]  ;;  %v1230_v63 = vpack.c.bf16 %v367_v55, %v363_v54  ;;  %v421_v49 = vld [vmem:[%s2749_s3 + $0x510] sm:$0xff] }
  0x44   :  { %1337 = vmatprep.subr.bf16.mxu1 %v1336_v23  ;;  %v1232_v1 = vpack.c.bf16 %v376_v57, %v372_v56  ;;  %v380_v22 = vld [vmem:[%s2749_s3 + $0x3c8] sm:$0xff]  ;;  %v398_v57 = vld [vmem:[%s2749_s3 + $0x458] sm:$0xff] }
  0x45   :  { %v384_v23 = vld [vmem:[%s2749_s3 + $0x3e8] sm:$0xff] }
  0x46   :  { %1211 = vmatpush1.bf16.msra.mxu0 %v1210_v3  ;;  %v375_v3 = vld [vmem:[%s2749_s3 + $0x3a0] sm:$0xff]  ;;  %v1236_v25 = vpack.c.bf16 %v384_v23, %v380_v22  ;;  %v396_v54 = vld [vmem:[%s2749_s3 + $0x448] sm:$0xff]  ;;  %v418_v22 = vld [vmem:[%s2749_s3 + $0x4f8] sm:$0xff] }
  0x47   :  { %1213 = vmatprep.subr.bf16.mxu0 %v1212_v5  ;;  %1339 = vmatpush1.bf16.msra.mxu1 %v1338_v34  ;;  %v1352_v5 = vpack.c.bf16 %v362_v0, %v358_v62  ;;  %v1234_v8 = vpack.c.bf16 %v375_v3, %v371_v2  ;;  %v388_v34 = vld [vmem:[%s2749_s3 + $0x408] sm:$0xff]  ;;  %v395_v62 = vld [vmem:[%s2749_s3 + $0x440] sm:$0xff]  ;;  %v397_v3 = vld [vmem:[%s2749_s3 + $0x450] sm:$0xff] }
  0x48   :  { %1341 = vmatprep.subr.bf16.mxu1 %v1340_v35  ;;  %v392_v35 = vld [vmem:[%s2749_s3 + $0x428] sm:$0xff] }
  0x49   :  { %v1240_v37 = vpack.c.bf16 %v392_v35, %v388_v34  ;;  %v400_v56 = vld [vmem:[%s2749_s3 + $0x468] sm:$0xff] }
  0x4a   :  { %1215 = vmatpush1.bf16.msra.mxu0 %v1214_v15  ;;  %v374_v15 = vld [vmem:[%s2749_s3 + $0x398] sm:$0xff]  ;;  %v424_v35 = vld [vmem:[%s2749_s3 + $0x528] sm:$0xff] }
  0x4b   :  { %1217 = vmatprep.subr.bf16.mxu0 %v1216_v17  ;;  %1343 = vmatpush1.bf16.msra.mxu1 %v1342_v46  ;;  %v1358_v17 = vpack.c.bf16 %v369_v14, %v365_v13  ;;  %v1360_v18 = vpack.c.bf16 %v378_v16, %v374_v15  ;;  %v407_v13 = vld [vmem:[%s2749_s3 + $0x4a0] sm:$0xff]  ;;  %v405_v16 = vld [vmem:[%s2749_s3 + $0x490] sm:$0xff] }
  0x4c   :  { %1345 = vmatprep.subr.bf16.mxu1 %v1344_v47 }
  0x4e   :  { %1219 = vmatpush1.bf16.msra.mxu0 %v1218_v27  ;;  %v379_v27 = vld [vmem:[%s2749_s3 + $0x3c0] sm:$0xff] }
  0x4f   :  { %1221 = vmatprep.subr.bf16.mxu0 %v1220_v29  ;;  %1347 = vmatpush1.bf16.msra.mxu1 %v1346_v58  ;;  %v1364_v29 = vpack.c.bf16 %v386_v26, %v382_v24  ;;  %v1238_v30 = vpack.c.bf16 %v383_v28, %v379_v27  ;;  %v402_v58 = vld [vmem:[%s2749_s3 + $0x478] sm:$0xff]  ;;  %v411_v26 = vld [vmem:[%s2749_s3 + $0x4c0] sm:$0xff] }
  0x50   :  { %1349 = vmatprep.subr.bf16.mxu1 %v1348_v59  ;;  %v1372_v2 = vpack.c.bf16 %v402_v58, %v398_v57  ;;  %v415_v27 = vld [vmem:[%s2749_s3 + $0x4e0] sm:$0xff] }
  0x51   :  { %v427_v57 = vld [vmem:[%s2749_s3 + $0x540] sm:$0xff] }
  0x52   :  { %1223 = vmatpush1.bf16.msra.mxu0 %v1222_v39  ;;  %v1368_v39 = vpack.c.bf16 %v394_v38, %v390_v36  ;;  %v422_v36 = vld [vmem:[%s2749_s3 + $0x518] sm:$0xff]  ;;  %v431_v58 = vld [vmem:[%s2749_s3 + $0x560] sm:$0xff] }
  0x53   :  { %1225 = vmatprep.subr.bf16.mxu0 %v1224_v41  ;;  %1351 = vmatpush1.bf16.msra.mxu1 %v1350_v4  ;;  %v2141_v41 = vshrl.u32 %v93_v40, 7  ;;  %v401_v4 = vld [vmem:[%s2749_s3 + $0x470] sm:$0xff]  ;;  %v1382_v40 = vpack.c.bf16 %v417_v32, %v413_v31  ;;  %v451_v31 = vld [vmem:[%s2749_s3 + $0x600] sm:$0xff] }
  0x54   :  { %1353 = vmatprep.subr.bf16.mxu1 %v1352_v5  ;;  %v404_v5 = vld [vmem:[%s2749_s3 + $0x488] sm:$0xff]  ;;  %v455_v32 = vld [vmem:[%s2749_s3 + $0x620] sm:$0xff] }
  0x55   :  { %v95_v42 = vsub.s32 0, %v2141_v41  ;;  %v99_v44 = vsub.s32 1, %v2141_v41  ;;  %v107_v6 = vsub.s32 3, %v2141_v41  ;;  %v1248_v14 = vpack.c.bf16 %v408_v7, %v404_v5  ;;  %v435_v5 = vld [vmem:[%s2749_s3 + $0x580] sm:$0xff] }
  0x56   :  { %1227 = vmatpush1.bf16.msra.mxu0 %v1226_v51  ;;  %v439_v7 = vld [vmem:[%s2749_s3 + $0x5a0] sm:$0xff] }
  0x57   :  { %1229 = vmatprep.subr.bf16.mxu0 %v1228_v53  ;;  %1355 = vmatpush1.bf16.msra.mxu1 %v1354_v11  ;;  %v96_v45 = vrot.slane %v2147_v43, %v95_v42  ;;  %v100_v46 = vrot.slane %v2147_v43, %v99_v44  ;;  %v393_v53 = vld [vmem:[%s2749_s3 + $0x430] sm:$0xff]  ;;  %v1374_v11 = vpack.c.bf16 %v401_v4, %v397_v3 }
  0x58   :  { %1357 = vmatprep.subr.bf16.mxu1 %v1356_v12  ;;  %v1370_v61 = vpack.c.bf16 %v393_v53, %v389_v52  ;;  %v403_v12 = vld [vmem:[%s2749_s3 + $0x480] sm:$0xff]  ;;  %v108_v19 = vrot.slane %v2147_v43, %v107_v6  ;;  %v432_v52 = vld [vmem:[%s2749_s3 + $0x568] sm:$0xff]  ;;  %v430_v53 = vld [vmem:[%s2749_s3 + $0x558] sm:$0xff]  ;;  %v1262_v3 = vpack.c.bf16 %v431_v58, %v427_v57 }
  0x59   :  { %v1250_v24 = vpack.c.bf16 %v407_v13, %v403_v12  ;;  %v444_v12 = vld [vmem:[%s2749_s3 + $0x5c8] sm:$0xff] }
  0x5a   :  { %1231 = vmatpush1.bf16.msra.mxu0 %v1230_v63  ;;  %v399_v63 = vld [vmem:[%s2749_s3 + $0x460] sm:$0xff]  ;;  %v448_v13 = vld [vmem:[%s2749_s3 + $0x5e8] sm:$0xff] }
  0x5b   :  { %1233 = vmatprep.subr.bf16.mxu0 %v1232_v1  ;;  %1359 = vmatpush1.bf16.msra.mxu1 %v1358_v17  ;;  %v1244_v1 = vpack.c.bf16 %v400_v56, %v396_v54  ;;  %v1246_v10 = vpack.c.bf16 %v399_v63, %v395_v62  ;;  %v409_v17 = vld [vmem:[%s2749_s3 + $0x4b0] sm:$0xff]  ;;  %v434_v54 = vld [vmem:[%s2749_s3 + $0x578] sm:$0xff]  ;;  %v436_v63 = vld [vmem:[%s2749_s3 + $0x588] sm:$0xff] }
  0x5c   :  { %1361 = vmatprep.subr.bf16.mxu1 %v1360_v18  ;;  %v412_v18 = vld [vmem:[%s2749_s3 + $0x4c8] sm:$0xff]  ;;  %v433_v62 = vld [vmem:[%s2749_s3 + $0x570] sm:$0xff] }
  0x5e   :  { %1235 = vmatpush1.bf16.msra.mxu0 %v1234_v8  ;;  %v406_v8 = vld [vmem:[%s2749_s3 + $0x498] sm:$0xff] }
  0x5f   :  { %1363 = vmatpush1.bf16.msra.mxu1 %v1362_v21  ;;  %1237 = vmatprep.subr.bf16.mxu0 %v1236_v25  ;;  %v1376_v15 = vpack.c.bf16 %v410_v9, %v406_v8  ;;  %v414_v21 = vld [vmem:[%s2749_s3 + $0x4d8] sm:$0xff]  ;;  %v1378_v25 = vpack.c.bf16 %v409_v17, %v405_v16  ;;  %v1266_v16 = vpack.c.bf16 %v439_v7, %v435_v5 }
  0x60   :  { %1365 = vmatprep.subr.bf16.mxu1 %v1364_v29  ;;  %v1252_v29 = vpack.c.bf16 %v416_v20, %v412_v18  ;;  %v443_v18 = vld [vmem:[%s2749_s3 + $0x5c0] sm:$0xff]  ;;  %v1268_v20 = vpack.c.bf16 %v448_v13, %v444_v12  ;;  %v477_v12 = vld [vmem:[%s2749_s3 + $0x6d0] sm:$0xff] }
  0x61   :  { %v481_v13 = vld [vmem:[%s2749_s3 + $0x6f0] sm:$0xff] }
  0x62   :  { %1239 = vmatpush1.bf16.msra.mxu0 %v1238_v30  ;;  %v1380_v30 = vpack.c.bf16 %v418_v22, %v414_v21  ;;  %v445_v22 = vld [vmem:[%s2749_s3 + $0x5d0] sm:$0xff] }
  0x63   :  { %1367 = vmatpush1.bf16.msra.mxu1 %v1366_v33  ;;  %1241 = vmatprep.subr.bf16.mxu0 %v1240_v37  ;;  %v420_v33 = vld [vmem:[%s2749_s3 + $0x508] sm:$0xff]  ;;  %v426_v37 = vld [vmem:[%s2749_s3 + $0x538] sm:$0xff] }
  0x64   :  { %1369 = vmatprep.subr.bf16.mxu1 %v1368_v39  ;;  %v1254_v39 = vpack.c.bf16 %v415_v27, %v411_v26  ;;  %v1384_v48 = vpack.c.bf16 %v426_v37, %v422_v36  ;;  %v456_v26 = vld [vmem:[%s2749_s3 + $0x628] sm:$0xff]  ;;  %v454_v27 = vld [vmem:[%s2749_s3 + $0x618] sm:$0xff]  ;;  %v457_v36 = vld [vmem:[%s2749_s3 + $0x630] sm:$0xff] }
  0x65   :  { %v460_v37 = vld [vmem:[%s2749_s3 + $0x648] sm:$0xff] }
  0xf8   :  { %v179_v47 = vpop.f32.mrb[0].mxu0 }
  0xf9   :  { %v180_v50 = vadd.f32 %v179_v47, %v96_v45  ;;  %v181_v51 = vpop.f32.mrb[1].mxu0  ;;  %v2232_v23 = vpop.f32.mrb[0].mxu1  ;;  %v419_v45 = vld [vmem:[%s2749_s3 + $0x500] sm:$0xff]  ;;  %v1256_v47 = vpack.c.bf16 %v424_v35, %v420_v33  ;;  %v453_v35 = vld [vmem:[%s2749_s3 + $0x610] sm:$0xff] }
  0xfa   :  { %v182_v55 = vadd.f32 %v181_v51, %v100_v46  ;;  %v252_v28 = vpop.f32.mrb[1].mxu1  ;;  %v423_v46 = vld [vmem:[%s2749_s3 + $0x520] sm:$0xff]  ;;  %v428_v51 = vld [vmem:[%s2749_s3 + $0x548] sm:$0xff] }
  0xfb   :  { %v255_v0 = vmax.f32 %v180_v50, 0.0  ;;  %v253_v34 = vadd.f32 %v252_v28, %v108_v19  ;;  %v425_v50 = vld [vmem:[%s2749_s3 + $0x530] sm:$0xff]  ;;  %v447_v19 = vld [vmem:[%s2749_s3 + $0x5e0] sm:$0xff]  ;;  %v458_v28 = vld [vmem:[%s2749_s3 + $0x638] sm:$0xff] }
  0xfc   :  { %v256_v59 = vmax.f32 %v182_v55, 0.0  ;;  %v1258_v55 = vpack.c.bf16 %v423_v46, %v419_v45  ;;  %v1386_v56 = vpack.c.bf16 %v425_v50, %v421_v49  ;;  %v1274_v45 = vpack.c.bf16 %v455_v32, %v451_v31 }
  0xfd   :  { %v258_v38 = vmax.f32 %v253_v34, 0.0  ;;  %v1400_v34 = vpack.c.bf16 %v458_v28, %v454_v27  ;;  %v1402_v46 = vpack.c.bf16 %v457_v36, %v453_v35  ;;  %v492_v27 = vld [vmem:[%s2749_s3 + $0x748] sm:$0xff] }
  0xfe   :  { %601 = vmatprep.mubr.f32.mxu0 %v256_v59  ;;  %743 = vmatprep.mubr.f32.mxu1 %v256_v59  ;;  %v1260_v59 = vpack.c.bf16 %v432_v52, %v428_v51  ;;  %v461_v51 = vld [vmem:[%s2749_s3 + $0x650] sm:$0xff]  ;;  %v496_v28 = vld [vmem:[%s2749_s3 + $0x768] sm:$0xff] }
  0xff   :  { %602 = vmatmul.mubr.f32.vlgmr.msra.gmra.mrb[2].mxu0 %v255_v0  ;;  %744 = vmatmul.mubr.f32.vlgmr.msra.gmra.mrb[2].mxu1 %v255_v0  ;;  %v440_v0 = vld [vmem:[%s2749_s3 + $0x5a8] sm:$0xff]  ;;  %v465_v52 = vld [vmem:[%s2749_s3 + $0x670] sm:$0xff]  ;;  %v1292_v35 = vpack.c.bf16 %v496_v28, %v492_v27 }
 0x100   :  { %1243 = vmatpush1.bf16.msra.mxu0 %v1242_v60  ;;  %1371 = vmatpush1.bf16.msra.mxu1 %v1370_v61  ;;  %v1388_v60 = vpack.c.bf16 %v434_v54, %v430_v53  ;;  %v429_v61 = vld [vmem:[%s2749_s3 + $0x550] sm:$0xff]  ;;  %v1264_v8 = vpack.c.bf16 %v440_v0, %v436_v63  ;;  %v468_v53 = vld [vmem:[%s2749_s3 + $0x688] sm:$0xff]  ;;  %v1406_v58 = vpack.c.bf16 %v465_v52, %v461_v51  ;;  %v103_v51 = vsub.s32 2, %v2141_v41  ;;  %v1041_v41 = vld [vmem:[%s2754_s6] ss:$0 sm:$0xff] }
 0x101   :  { %1245 = vmatprep.subr.bf16.mxu0 %v1244_v1  ;;  %1373 = vmatprep.subr.bf16.mxu1 %v1372_v2  ;;  %v438_v1 = vld [vmem:[%s2749_s3 + $0x598] sm:$0xff]  ;;  %v1390_v4 = vpack.c.bf16 %v433_v62, %v429_v61  ;;  %v472_v54 = vld [vmem:[%s2749_s3 + $0x6a8] sm:$0xff]  ;;  %v469_v63 = vld [vmem:[%s2749_s3 + $0x690] sm:$0xff] }
 0x102   :  { %672 = vmatprep.mubr.f32.mxu0 %v258_v38  ;;  %814 = vmatprep.mubr.f32.mxu1 %v258_v38  ;;  %v442_v2 = vld [vmem:[%s2749_s3 + $0x5b8] sm:$0xff]  ;;  %v464_v38 = vld [vmem:[%s2749_s3 + $0x668] sm:$0xff]  ;;  %v1280_v61 = vpack.c.bf16 %v472_v54, %v468_v53  ;;  %v473_v0 = vld [vmem:[%s2749_s3 + $0x6b0] sm:$0xff] }
 0x103   :  { %v1392_v9 = vpack.c.bf16 %v442_v2, %v438_v1  ;;  %v1276_v49 = vpack.c.bf16 %v464_v38, %v460_v37  ;;  %v476_v1 = vld [vmem:[%s2749_s3 + $0x6c8] sm:$0xff]  ;;  %v1410_v7 = vpack.c.bf16 %v473_v0, %v469_v63  ;;  %v493_v37 = vld [vmem:[%s2749_s3 + $0x750] sm:$0xff]  ;;  %v511_v63 = vld [vmem:[%s2749_s3 + $0x7e0] sm:$0xff]  ;;  %v104_v0 = vrot.slane %v2147_v43, %v103_v51 }
 0x104   :  { %1247 = vmatpush1.bf16.msra.mxu0 %v1246_v10  ;;  %1375 = vmatpush1.bf16.msra.mxu1 %v1374_v11  ;;  %v437_v10 = vld [vmem:[%s2749_s3 + $0x590] sm:$0xff]  ;;  %v480_v2 = vld [vmem:[%s2749_s3 + $0x6e8] sm:$0xff] }
 0x105   :  { %1249 = vmatprep.subr.bf16.mxu0 %v1248_v14  ;;  %1377 = vmatprep.subr.bf16.mxu1 %v1376_v15  ;;  %v441_v11 = vld [vmem:[%s2749_s3 + $0x5b0] sm:$0xff]  ;;  %v446_v14 = vld [vmem:[%s2749_s3 + $0x5d8] sm:$0xff]  ;;  %v842_v43 = vld [vmem:[%s2752_s5 + $0x88] sm:$0xff] }
 0x106   :  { %v450_v15 = vld [vmem:[%s2749_s3 + $0x5f8] sm:$0xff]  ;;  %v1394_v17 = vpack.c.bf16 %v441_v11, %v437_v10  ;;  %v1284_v10 = vpack.c.bf16 %v480_v2, %v476_v1  ;;  %v497_v38 = vld [vmem:[%s2749_s3 + $0x770] sm:$0xff] }
 0x107   :  { %v1396_v21 = vpack.c.bf16 %v450_v15, %v446_v14  ;;  %v484_v14 = vld [vmem:[%s2749_s3 + $0x708] sm:$0xff]  ;;  %v501_v54 = vld [vmem:[%s2749_s3 + $0x790] sm:$0xff] }
 0x108   :  { %1251 = vmatpush1.bf16.msra.mxu0 %v1250_v24  ;;  %1379 = vmatpush1.bf16.msra.mxu1 %v1378_v25  ;;  %v449_v24 = vld [vmem:[%s2749_s3 + $0x5f0] sm:$0xff]  ;;  %v452_v25 = vld [vmem:[%s2749_s3 + $0x608] sm:$0xff] }
 0x109   :  { %1253 = vmatprep.subr.bf16.mxu0 %v1252_v29  ;;  %1381 = vmatprep.subr.bf16.mxu1 %v1380_v30  ;;  %v1270_v29 = vpack.c.bf16 %v447_v19, %v443_v18  ;;  %v1398_v30 = vpack.c.bf16 %v449_v24, %v445_v22  ;;  %v1272_v33 = vpack.c.bf16 %v456_v26, %v452_v25  ;;  %v488_v15 = vld [vmem:[%s2749_s3 + $0x728] sm:$0xff]  ;;  %v485_v25 = vld [vmem:[%s2749_s3 + $0x710] sm:$0xff] }
 0x10a   :  { %v1414_v19 = vpack.c.bf16 %v481_v13, %v477_v12  ;;  %v1288_v22 = vpack.c.bf16 %v488_v15, %v484_v14  ;;  %v489_v26 = vld [vmem:[%s2749_s3 + $0x730] sm:$0xff]  ;;  %v826_v12 = vld [vmem:[%s2752_s5 + $0x8] sm:$0xff]  ;;  %v251_v13 = vadd.f32 %v2232_v23, %v104_v0  ;;  %v844_v23 = vld [vmem:[%s2752_s5 + $0x98] sm:$0xff] }
 0x10b   :  { %v1418_v32 = vpack.c.bf16 %v489_v26, %v485_v25  ;;  %v828_v25 = vld [vmem:[%s2752_s5 + $0x18] sm:$0xff] }
 0x10c   :  { %1255 = vmatpush1.bf16.msra.mxu0 %v1254_v39  ;;  %1383 = vmatpush1.bf16.msra.mxu1 %v1382_v40  ;;  %v462_v39 = vld [vmem:[%s2749_s3 + $0x658] sm:$0xff]  ;;  %v257_v26 = vmax.f32 %v251_v13, 0.0 }
 0x10d   :  { %1257 = vmatprep.subr.bf16.mxu0 %v1256_v47  ;;  %1385 = vmatprep.subr.bf16.mxu1 %v1384_v48  ;;  %v466_v40 = vld [vmem:[%s2749_s3 + $0x678] sm:$0xff]  ;;  %v459_v47 = vld [vmem:[%s2749_s3 + $0x640] sm:$0xff] }
 0x10e   :  { %v463_v48 = vld [vmem:[%s2749_s3 + $0x660] sm:$0xff]  ;;  %v1404_v50 = vpack.c.bf16 %v466_v40, %v462_v39  ;;  %v500_v39 = vld [vmem:[%s2749_s3 + $0x788] sm:$0xff] }
 0x10f   :  { %v1278_v57 = vpack.c.bf16 %v463_v48, %v459_v47  ;;  %v504_v40 = vld [vmem:[%s2749_s3 + $0x7a8] sm:$0xff]  ;;  %v1422_v48 = vpack.c.bf16 %v497_v38, %v493_v37  ;;  %v829_v37 = vld [vmem:[%s2752_s5 + $0x20] sm:$0xff] }
 0x110   :  { %1259 = vmatpush1.bf16.msra.mxu0 %v1258_v55  ;;  %1387 = vmatpush1.bf16.msra.mxu1 %v1386_v56  ;;  %v470_v55 = vld [vmem:[%s2749_s3 + $0x698] sm:$0xff]  ;;  %v1296_v52 = vpack.c.bf16 %v504_v40, %v500_v39  ;;  %v830_v38 = vld [vmem:[%s2752_s5 + $0x28] sm:$0xff] }
 0x111   :  { %1261 = vmatprep.subr.bf16.mxu0 %v1260_v59  ;;  %1389 = vmatprep.subr.bf16.mxu1 %v1388_v60  ;;  %v474_v56 = vld [vmem:[%s2749_s3 + $0x6b8] sm:$0xff]  ;;  %v467_v59 = vld [vmem:[%s2749_s3 + $0x680] sm:$0xff] }
 0x112   :  { %v471_v60 = vld [vmem:[%s2749_s3 + $0x6a0] sm:$0xff]  ;;  %v1408_v62 = vpack.c.bf16 %v474_v56, %v470_v55  ;;  %v505_v55 = vld [vmem:[%s2749_s3 + $0x7b0] sm:$0xff]  ;;  %v508_v56 = vld [vmem:[%s2749_s3 + $0x7c8] sm:$0xff] }
 0x113   :  { %v1282_v5 = vpack.c.bf16 %v471_v60, %v467_v59  ;;  %v514_v59 = vld [vmem:[%s2749_s3 + $0x7f8] sm:$0xff] }
 0x114   :  { %1263 = vmatpush1.bf16.msra.mxu0 %v1262_v3  ;;  %1391 = vmatpush1.bf16.msra.mxu1 %v1390_v4  ;;  %v478_v3 = vld [vmem:[%s2749_s3 + $0x6d8] sm:$0xff] }
 0x115   :  { %1265 = vmatprep.subr.bf16.mxu0 %v1264_v8  ;;  %1393 = vmatprep.subr.bf16.mxu1 %v1392_v9  ;;  %v482_v4 = vld [vmem:[%s2749_s3 + $0x6f8] sm:$0xff]  ;;  %v475_v8 = vld [vmem:[%s2749_s3 + $0x6c0] sm:$0xff] }
 0x116   :  { %v479_v9 = vld [vmem:[%s2749_s3 + $0x6e0] sm:$0xff]  ;;  %v1412_v11 = vpack.c.bf16 %v482_v4, %v478_v3  ;;  %v509_v3 = vld [vmem:[%s2749_s3 + $0x7d0] sm:$0xff] }
 0x117   :  { %v1286_v18 = vpack.c.bf16 %v479_v9, %v475_v8  ;;  %v513_v4 = vld [vmem:[%s2749_s3 + $0x7f0] sm:$0xff]  ;;  %v874_v8 = vld [vmem:[%s2752_s5 + $0x188] sm:$0xff] }
 0x118   :  { %1267 = vmatpush1.bf16.msra.mxu0 %v1266_v16  ;;  %1395 = vmatpush1.bf16.msra.mxu1 %v1394_v17  ;;  %v486_v16 = vld [vmem:[%s2749_s3 + $0x718] sm:$0xff] }
 0x119   :  { %1269 = vmatprep.subr.bf16.mxu0 %v1268_v20  ;;  %1397 = vmatprep.subr.bf16.mxu1 %v1396_v21  ;;  %v490_v17 = vld [vmem:[%s2749_s3 + $0x738] sm:$0xff]  ;;  %v483_v20 = vld [vmem:[%s2749_s3 + $0x700] sm:$0xff] }
 0x11a   :  { %v487_v21 = vld [vmem:[%s2749_s3 + $0x720] sm:$0xff]  ;;  %v1416_v24 = vpack.c.bf16 %v490_v17, %v486_v16  ;;  %v858_v17 = vld [vmem:[%s2752_s5 + $0x108] sm:$0xff] }
 0x11b   :  { %v1290_v31 = vpack.c.bf16 %v487_v21, %v483_v20  ;;  %v857_v16 = vld [vmem:[%s2752_s5 + $0x100] sm:$0xff]  ;;  %v876_v20 = vld [vmem:[%s2752_s5 + $0x198] sm:$0xff] }
 0x11c   :  { %1271 = vmatpush1.bf16.msra.mxu0 %v1270_v29  ;;  %1399 = vmatpush1.bf16.msra.mxu1 %v1398_v30  ;;  %v494_v29 = vld [vmem:[%s2749_s3 + $0x758] sm:$0xff] }
 0x11d   :  { %1273 = vmatprep.subr.bf16.mxu0 %v1272_v33  ;;  %1401 = vmatprep.subr.bf16.mxu1 %v1400_v34  ;;  %v498_v30 = vld [vmem:[%s2749_s3 + $0x778] sm:$0xff]  ;;  %v491_v33 = vld [vmem:[%s2749_s3 + $0x740] sm:$0xff] }
 0x11e   :  { %v495_v34 = vld [vmem:[%s2749_s3 + $0x760] sm:$0xff]  ;;  %v1420_v36 = vpack.c.bf16 %v498_v30, %v494_v29  ;;  %v859_v29 = vld [vmem:[%s2752_s5 + $0x110] sm:$0xff]  ;;  %v860_v30 = vld [vmem:[%s2752_s5 + $0x118] sm:$0xff] }
 0x11f   :  { %v1294_v47 = vpack.c.bf16 %v495_v34, %v491_v33  ;;  %v877_v33 = vld [vmem:[%s2752_s5 + $0x1a0] sm:$0xff]  ;;  %v878_v34 = vld [vmem:[%s2752_s5 + $0x1a8] sm:$0xff] }
 0x120   :  { %1275 = vmatpush1.bf16.msra.mxu0 %v1274_v45  ;;  %1403 = vmatpush1.bf16.msra.mxu1 %v1402_v46  ;;  %v502_v45 = vld [vmem:[%s2749_s3 + $0x798] sm:$0xff]  ;;  %v1472_v40 = vpack.c.bf16 %v878_v34, %v877_v33  ;;  %v855_v34 = vld [vmem:[%s2752_s5 + $0xf0] sm:$0xff] }
 0x121   :  { %1277 = vmatprep.subr.bf16.mxu0 %v1276_v49  ;;  %1405 = vmatprep.subr.bf16.mxu1 %v1404_v50  ;;  %v506_v46 = vld [vmem:[%s2749_s3 + $0x7b8] sm:$0xff]  ;;  %v499_v49 = vld [vmem:[%s2749_s3 + $0x780] sm:$0xff] }
 0x122   :  { %v503_v50 = vld [vmem:[%s2749_s3 + $0x7a0] sm:$0xff]  ;;  %v1424_v53 = vpack.c.bf16 %v506_v46, %v502_v45  ;;  %v862_v46 = vld [vmem:[%s2752_s5 + $0x128] sm:$0xff] }
 0x123   :  { %v1298_v60 = vpack.c.bf16 %v503_v50, %v499_v49  ;;  %v861_v45 = vld [vmem:[%s2752_s5 + $0x120] sm:$0xff]  ;;  %v879_v49 = vld [vmem:[%s2752_s5 + $0x1b0] sm:$0xff]  ;;  %v880_v50 = vld [vmem:[%s2752_s5 + $0x1b8] sm:$0xff] }
 0x124   :  { %1279 = vmatpush1.bf16.msra.mxu0 %v1278_v57  ;;  %1407 = vmatpush1.bf16.msra.mxu1 %v1406_v58  ;;  %v512_v57 = vld [vmem:[%s2749_s3 + $0x7e8] sm:$0xff]  ;;  %v510_v58 = vld [vmem:[%s2749_s3 + $0x7d8] sm:$0xff] }
 0x125   :  { %1281 = vmatprep.subr.bf16.mxu0 %v1280_v61  ;;  %1409 = vmatprep.subr.bf16.mxu1 %v1408_v62  ;;  %v1426_v61 = vpack.c.bf16 %v505_v55, %v501_v54  ;;  %v507_v62 = vld [vmem:[%s2749_s3 + $0x7c0] sm:$0xff]  ;;  %v1300_v1 = vpack.c.bf16 %v512_v57, %v508_v56  ;;  %v1428_v2 = vpack.c.bf16 %v514_v59, %v510_v58  ;;  %v831_v54 = vld [vmem:[%s2752_s5 + $0x30] sm:$0xff]  ;;  %v832_v55 = vld [vmem:[%s2752_s5 + $0x38] sm:$0xff] }
 0x126   :  { %v1302_v9 = vpack.c.bf16 %v511_v63, %v507_v62  ;;  %v1476_v57 = vpack.c.bf16 %v880_v50, %v879_v49  ;;  %v863_v58 = vld [vmem:[%s2752_s5 + $0x130] sm:$0xff]  ;;  %v864_v59 = vld [vmem:[%s2752_s5 + $0x138] sm:$0xff]  ;;  %v881_v62 = vld [vmem:[%s2752_s5 + $0x1c0] sm:$0xff]  ;;  %v1446_v0 = vpack.c.bf16 %v832_v55, %v831_v54 }
 0x127   :  { %v882_v63 = vld [vmem:[%s2752_s5 + $0x1c8] sm:$0xff]  ;;  %v515_v50 = vld [vmem:[%s2753_s4] sm:$0xf] }
 0x128   :  { %1283 = vmatpush1.bf16.msra.mxu0 %v1282_v5  ;;  %1411 = vmatpush1.bf16.msra.mxu1 %v1410_v7  ;;  %v841_v5 = vld [vmem:[%s2752_s5 + $0x80] sm:$0xff]  ;;  %v524_v54 = vrot.slane %v515_v50, %v99_v44  ;;  %v532_v55 = vrot.slane %v515_v50, %v107_v6 }
 0x129   :  { %1285 = vmatprep.subr.bf16.mxu0 %v1284_v10  ;;  %1413 = vmatprep.subr.bf16.mxu1 %v1412_v11  ;;  %v873_v7 = vld [vmem:[%s2752_s5 + $0x180] sm:$0xff]  ;;  %v1430_v10 = vpack.c.bf16 %v513_v4, %v509_v3  ;;  %v1432_v14 = vpack.c.bf16 %v842_v43, %v841_v5  ;;  %v834_v3 = vld [vmem:[%s2752_s5 + $0x48] sm:$0xff]  ;;  %v1480_v5 = vpack.c.bf16 %v882_v63, %v881_v62 }
 0x12a   :  { %v825_v11 = vld [vmem:[%s2752_s5] sm:$0xff]  ;;  %v1464_v15 = vpack.c.bf16 %v874_v8, %v873_v7  ;;  %v866_v7 = vld [vmem:[%s2752_s5 + $0x148] sm:$0xff]  ;;  %v851_v8 = vld [vmem:[%s2752_s5 + $0xd0] sm:$0xff] }
 0x12b   :  { %v1434_v21 = vpack.c.bf16 %v826_v12, %v825_v11  ;;  %v865_v43 = vld [vmem:[%s2752_s5 + $0x140] sm:$0xff]  ;;  %v884_v11 = vld [vmem:[%s2752_s5 + $0x1d8] sm:$0xff] }
 0x12c   :  { %1287 = vmatpush1.bf16.msra.mxu0 %v1286_v18  ;;  %1415 = vmatpush1.bf16.msra.mxu1 %v1414_v19  ;;  %v843_v18 = vld [vmem:[%s2752_s5 + $0x90] sm:$0xff]  ;;  %v1482_v13 = vpack.c.bf16 %v866_v7, %v865_v43 }
 0x12d   :  { %1289 = vmatprep.subr.bf16.mxu0 %v1288_v22  ;;  %1417 = vmatprep.subr.bf16.mxu1 %v1416_v24  ;;  %v875_v19 = vld [vmem:[%s2752_s5 + $0x190] sm:$0xff]  ;;  %v1466_v22 = vpack.c.bf16 %v858_v17, %v857_v16  ;;  %v1436_v27 = vpack.c.bf16 %v844_v23, %v843_v18  ;;  %v868_v23 = vld [vmem:[%s2752_s5 + $0x158] sm:$0xff] }
 0x12e   :  { %v827_v24 = vld [vmem:[%s2752_s5 + $0x10] sm:$0xff]  ;;  %v1468_v28 = vpack.c.bf16 %v876_v20, %v875_v19  ;;  %v853_v19 = vld [vmem:[%s2752_s5 + $0xe0] sm:$0xff]  ;;  %v854_v20 = vld [vmem:[%s2752_s5 + $0xe8] sm:$0xff] }
 0x12f   :  { %v867_v18 = vld [vmem:[%s2752_s5 + $0x150] sm:$0xff] }
 0x130   :  { %1291 = vmatpush1.bf16.msra.mxu0 %v1290_v31  ;;  %1419 = vmatpush1.bf16.msra.mxu1 %v1418_v32  ;;  %v845_v31 = vld [vmem:[%s2752_s5 + $0xa0] sm:$0xff]  ;;  %v846_v32 = vld [vmem:[%s2752_s5 + $0xa8] sm:$0xff] }
 0x131   :  { %1293 = vmatprep.subr.bf16.mxu0 %v1292_v35  ;;  %1421 = vmatprep.subr.bf16.mxu1 %v1420_v36  ;;  %v1438_v35 = vpack.c.bf16 %v828_v25, %v827_v24  ;;  %v1470_v36 = vpack.c.bf16 %v860_v30, %v859_v29  ;;  %v1440_v39 = vpack.c.bf16 %v846_v32, %v845_v31  ;;  %v838_v29 = vld [vmem:[%s2752_s5 + $0x68] sm:$0xff]  ;;  %v869_v30 = vld [vmem:[%s2752_s5 + $0x160] sm:$0xff] }
 0x132   :  { %v1486_v25 = vpack.c.bf16 %v868_v23, %v867_v18  ;;  %v870_v32 = vld [vmem:[%s2752_s5 + $0x168] sm:$0xff] }
 0x133   :  { %v1490_v33 = vpack.c.bf16 %v870_v32, %v869_v30 }
 0x134   :  { %1295 = vmatpush1.bf16.msra.mxu0 %v1294_v47  ;;  %1423 = vmatpush1.bf16.msra.mxu1 %v1422_v48  ;;  %v847_v47 = vld [vmem:[%s2752_s5 + $0xb0] sm:$0xff]  ;;  %v848_v48 = vld [vmem:[%s2752_s5 + $0xb8] sm:$0xff] }
 0x135   :  { %1297 = vmatprep.subr.bf16.mxu0 %v1296_v52  ;;  %1425 = vmatprep.subr.bf16.mxu1 %v1424_v53  ;;  %v1442_v52 = vpack.c.bf16 %v830_v38, %v829_v37  ;;  %v1474_v53 = vpack.c.bf16 %v862_v46, %v861_v45  ;;  %v1444_v56 = vpack.c.bf16 %v848_v48, %v847_v47  ;;  %v888_v38 = vld [vmem:[%s2752_s5 + $0x1f8] sm:$0xff]  ;;  %v871_v47 = vld [vmem:[%s2752_s5 + $0x170] sm:$0xff] }
 0x136   :  { %v872_v48 = vld [vmem:[%s2752_s5 + $0x178] sm:$0xff] }
 0x137   :  { %v1494_v49 = vpack.c.bf16 %v872_v48, %v871_v47 }
 0x138   :  { %1299 = vmatpush1.bf16.msra.mxu0 %v1298_v60  ;;  %1427 = vmatpush1.bf16.msra.mxu1 %v1426_v61  ;;  %v849_v60 = vld [vmem:[%s2752_s5 + $0xc0] sm:$0xff]  ;;  %v850_v61 = vld [vmem:[%s2752_s5 + $0xc8] sm:$0xff] }
 0x139   :  { %1301 = vmatprep.subr.bf16.mxu0 %v1300_v1  ;;  %1429 = vmatprep.subr.bf16.mxu1 %v1428_v2  ;;  %v1478_v1 = vpack.c.bf16 %v864_v59, %v863_v58  ;;  %v833_v2 = vld [vmem:[%s2752_s5 + $0x40] sm:$0xff]  ;;  %v1448_v4 = vpack.c.bf16 %v850_v61, %v849_v60 }
 0x13a   :  { %v1450_v12 = vpack.c.bf16 %v834_v3, %v833_v2 }
 0x13c   :  { %1303 = vmatpush1.bf16.msra.mxu0 %v1302_v9  ;;  %1431 = vmatpush1.bf16.msra.mxu1 %v1430_v10  ;;  %v852_v9 = vld [vmem:[%s2752_s5 + $0xd8] sm:$0xff]  ;;  %v883_v10 = vld [vmem:[%s2752_s5 + $0x1d0] sm:$0xff] }
 0x13d   :  { %1433 = vmatprep.subr.bf16.mxu0 %v1432_v14  ;;  %1465 = vmatprep.subr.bf16.mxu1 %v1464_v15  ;;  %v835_v14 = vld [vmem:[%s2752_s5 + $0x50] sm:$0xff]  ;;  %v836_v15 = vld [vmem:[%s2752_s5 + $0x58] sm:$0xff]  ;;  %v1452_v16 = vpack.c.bf16 %v852_v9, %v851_v8  ;;  %v1484_v17 = vpack.c.bf16 %v884_v11, %v883_v10 }
 0x13e   :  { %v1454_v24 = vpack.c.bf16 %v836_v15, %v835_v14 }
 0x13f   :  { %673 = vmatmul.mubr.f32.vlgmr.msra.gmra.mrb[2].mxu0 %v257_v26  ;;  %815 = vmatmul.mubr.f32.vlgmr.msra.gmra.mrb[2].mxu1 %v257_v26  ;;  %v1456_v26 = vpack.c.bf16 %v854_v20, %v853_v19 }
 0x140   :  { %1435 = vmatpush3.bf16.msra.mxu0 %v1434_v21  ;;  %1467 = vmatpush3.bf16.msra.mxu1 %v1466_v22  ;;  %v885_v21 = vld [vmem:[%s2752_s5 + $0x1e0] sm:$0xff]  ;;  %v886_v22 = vld [vmem:[%s2752_s5 + $0x1e8] sm:$0xff] }
 0x141   :  { %1437 = vmatprep.subr.bf16.mxu0 %v1436_v27  ;;  %1469 = vmatprep.subr.bf16.mxu1 %v1468_v28  ;;  %v1488_v27 = vpack.c.bf16 %v886_v22, %v885_v21  ;;  %v837_v28 = vld [vmem:[%s2752_s5 + $0x60] sm:$0xff] }
 0x142   :  { %v1458_v31 = vpack.c.bf16 %v838_v29, %v837_v28 }
 0x144   :  { %1439 = vmatpush3.bf16.msra.mxu0 %v1438_v35  ;;  %1471 = vmatpush3.bf16.msra.mxu1 %v1470_v36  ;;  %v856_v35 = vld [vmem:[%s2752_s5 + $0xf8] sm:$0xff]  ;;  %v887_v36 = vld [vmem:[%s2752_s5 + $0x1f0] sm:$0xff] }
 0x145   :  { %1441 = vmatprep.subr.bf16.mxu0 %v1440_v39  ;;  %1473 = vmatprep.subr.bf16.mxu1 %v1472_v40  ;;  %v1460_v37 = vpack.c.bf16 %v856_v35, %v855_v34  ;;  %v839_v39 = vld [vmem:[%s2752_s5 + $0x70] sm:$0xff]  ;;  %v840_v40 = vld [vmem:[%s2752_s5 + $0x78] sm:$0xff]  ;;  %v1492_v45 = vpack.c.bf16 %v888_v38, %v887_v36 }
 0x146   :  { %v1462_v46 = vpack.c.bf16 %v840_v40, %v839_v39 }
 0x148   :  { %1443 = vmatpush3.bf16.msra.mxu0 %v1442_v52  ;;  %1475 = vmatpush3.bf16.msra.mxu1 %v1474_v53  ;;  %v520_v52 = vrot.slane %v515_v50, %v95_v42  ;;  %v528_v53 = vrot.slane %v515_v50, %v103_v51 }
 0x149   :  { %1445 = vmatprep.subr.bf16.mxu0 %v1444_v56  ;;  %1477 = vmatprep.subr.bf16.mxu1 %v1476_v57 }
 0x14c   :  { %1447 = vmatpush3.bf16.msra.mxu0 %v1446_v0  ;;  %1479 = vmatpush3.bf16.msra.mxu1 %v1478_v1 }
 0x14d   :  { %1449 = vmatprep.subr.bf16.mxu0 %v1448_v4  ;;  %1481 = vmatprep.subr.bf16.mxu1 %v1480_v5 }
 0x150   :  { %1451 = vmatpush3.bf16.msra.mxu0 %v1450_v12  ;;  %1483 = vmatpush3.bf16.msra.mxu1 %v1482_v13 }
 0x151   :  { %1453 = vmatprep.subr.bf16.mxu0 %v1452_v16  ;;  %1485 = vmatprep.subr.bf16.mxu1 %v1484_v17 }
 0x154   :  { %1455 = vmatpush3.bf16.msra.mxu0 %v1454_v24  ;;  %1487 = vmatpush3.bf16.msra.mxu1 %v1486_v25 }
 0x155   :  { %1457 = vmatprep.subr.bf16.mxu0 %v1456_v26  ;;  %1489 = vmatprep.subr.bf16.mxu1 %v1488_v27 }
 0x158   :  { %1459 = vmatpush3.bf16.msra.mxu0 %v1458_v31  ;;  %1491 = vmatpush3.bf16.msra.mxu1 %v1490_v33 }
 0x159   :  { %1461 = vmatprep.subr.bf16.mxu0 %v1460_v37  ;;  %1493 = vmatprep.subr.bf16.mxu1 %v1492_v45 }
 0x15c   :  { %1463 = vmatpush3.bf16.msra.mxu0 %v1462_v46  ;;  %1495 = vmatpush3.bf16.msra.mxu1 %v1494_v49 }
 0x212   :  { %v674_v56 = vpop.f32.mrb[2].mxu0  ;;  %v816_v57 = vpop.f32.mrb[2].mxu1 }
 0x213   :  { %v1496_v58 = vadd.f32 %v674_v56, %v520_v52  ;;  %v1498_v59 = vadd.f32 %v816_v57, %v528_v53  ;;  %v676_v60 = vpop.f32.mrb[3].mxu0  ;;  %v818_v61 = vpop.f32.mrb[3].mxu1 }
 0x214   :  { %v1497_v62 = vadd.f32 %v676_v60, %v524_v54  ;;  %v1499_v63 = vadd.f32 %v818_v61, %v532_v55 }
 0x215   :  { %v821_v42 = vmax.f32 %v1496_v58, 0.0  ;;  %v823_v2 = vmax.f32 %v1498_v59, 0.0 }
 0x216   :  { %v822_v0 = vmax.f32 %v1497_v62, 0.0  ;;  %v824_v1 = vmax.f32 %v1499_v63, 0.0 }
 0x218   :  { %960 = vmatprep.mubr.f32.mxu0 %v822_v0  ;;  %1030 = vmatprep.mubr.f32.mxu1 %v824_v1 }
 0x219   :  { %961 = vmatmul.mubr.f32.vlgmr.msra.gmra.mrb[4].mxu0 %v821_v42  ;;  %1031 = vmatmul.mubr.f32.vlgmr.msra.gmra.mrb[4].mxu1 %v823_v2 }
 0x2ec   :  { %v1074_v44 = vpop.f32.mrb[4].mxu0  ;;  %v1109_v51 = vpop.f32.mrb[4].mxu1 }
 0x2ed   :  { %v1075_v6 = vpop.f32.mrb[5].mxu0  ;;  %v1110_v3 = vpop.f32.mrb[5].mxu1 }
 0x2ee   :  { %v1076_v4 = vadd.f32 %v1075_v6, %v1074_v44  ;;  %v1111_v5 = vadd.f32 %v1110_v3, %v1109_v51 }
 0x2f0   :  { %v963_v43 = vadd.f32 %v1076_v4, %v1041_v41 }
 0x2f2   :  { %v1033_v7 = vadd.f32 %v1111_v5, %v963_v43 }
 0x2f4   :  { %1036 = vst [vmem:[%s2755_s7] sm:$0xff] %v1033_v7 }

</bundles_post_ra>
